<compile_context>
chip_gen: v6e
topology: v6e:2x2x1
jax: 0.10.0
libtpu: 0.0.40
codegen_flags: <defaults>
</compile_context>

<pallas_src>
import numpy as np
import jax
import jax.numpy as jnp
from jax import lax
from jax.experimental import pallas as pl
from jax.experimental.pallas import tpu as pltpu


# ----------------------------------------------------------------------------
# host-side (setup-time) constant builders — run once, hoisted out of forward
# ----------------------------------------------------------------------------
def _bilinear_matrix(n_in: int, n_out: int) -> np.ndarray:
    """Interpolation matrix (n_out, n_in) for align_corners=True bilinear."""
    if n_in == 1:
        return np.ones((n_out, 1), np.float32)
    src = np.arange(n_out, dtype=np.float64) * (n_in - 1) / (n_out - 1)
    i0 = np.clip(np.floor(src).astype(np.int64), 0, n_in - 1)
    i1 = np.clip(i0 + 1, 0, n_in - 1)
    frac = (src - i0).astype(np.float32)
    U = np.zeros((n_out, n_in), np.float32)
    U[np.arange(n_out), i0] += (1.0 - frac)
    U[np.arange(n_out), i1] += frac
    return U


def _band_weights(w_hwio: np.ndarray, w_out: int) -> np.ndarray:
    """3x3 conv (stride 1, padding=1) along W as 3 banded matmul weights.

    The W-direction zero-pad is folded in (out-of-range kw taps are dropped
    for border output columns), so the conv reads the *unpadded* flat-HWC slab
    with K = w_out*Cin:
        out[r, w*Cout+co] = sum_kh ( x_hpad[r+kh, :] @ band[kh] )[w*Cout+co]
    where x_hpad is the H-padded (but not W-padded) flat slab.
    """
    kh_, kw_, cin, cout = w_hwio.shape
    band = np.zeros((kh_, w_out * cin, w_out * cout), np.float32)
    for kh in range(kh_):
        for w in range(w_out):
            for kw in range(kw_):
                wi = w + kw - 1
                if 0 <= wi < w_out:
                    band[kh, wi * cin:(wi + 1) * cin,
                         w * cout:(w + 1) * cout] = w_hwio[kh, kw]
    return band


def prepare_up2c(params, x1_shape, x2_shape, m_target=256):
    """Precompute every constant operand of the fused kernel (called once)."""
    N, C1, H1, W1 = x1_shape
    N2, C2, H2, W2 = x2_shape
    assert N == N2
    w1 = np.asarray(params["w1"], np.float32)        # (3,3,C2+C1,Cmid) HWIO
    b1 = np.asarray(params["b1"], np.float32)
    w2 = np.asarray(params["w2"], np.float32)        # (3,3,Cmid,Cout)
    b2 = np.asarray(params["b2"], np.float32)
    Cmid, Cout = int(w1.shape[-1]), int(w2.shape[-1])

    # Batch block size: rows per sample in the stacked padded slab = H2+2;
    # pick the largest divisor of N keeping M = NB*(H2+2) near m_target.
    nb = max(1, min(N, m_target // (H2 + 2)))
    while N % nb:
        nb -= 1

    dY, dX = H2 - 2 * H1, W2 - 2 * W1
    # PyTorch's F.pad with a negative diff would crop; not supported here.
    assert dY >= 0 and dX >= 0, "x1 upsampled larger than x2 is not supported"

    # H-interp matrix: Up2C diff-pad AND conv H-pad folded in as zero rows,
    # block-diagonal over the NB samples of a batch block.
    uh_full = np.zeros((H2 + 2, H1), np.float32)
    uh_full[1 + dY // 2: 1 + dY // 2 + 2 * H1, :] = _bilinear_matrix(H1, 2 * H1)
    uh_stacked = np.kron(np.eye(nb, dtype=np.float32), uh_full)  # (nb*(H2+2), nb*H1)

    # W-interp (+ diff-pad) as a plain 2D matrix on the flat W*C axis.
    uw_full = np.zeros((W2, W1), np.float32)
    uw_full[dX // 2: dX // 2 + 2 * W1, :] = _bilinear_matrix(W1, 2 * W1)
    uwc = np.kron(uw_full, np.eye(C1, dtype=np.float32)).T       # (W1*C1, W2*C1)

    # concat([x2, x1u], channel) folded into conv1 by splitting w1 along Cin;
    # the W-upsample is folded into the x1 branch's banded weights.
    w1a = _band_weights(w1[:, :, :C2, :], W2)                    # (3, W2*C2, W2*Cmid)
    w1b = _band_weights(w1[:, :, C2:, :], W2)                    # (3, W2*C1, W2*Cmid)
    w1b_fused = np.einsum("ij,kjl->kil", uwc, w1b)               # (3, W1*C1, W2*Cmid)
    w2b = _band_weights(w2, W2)                                  # (3, W2*Cmid, W2*Cout)

    return dict(
        uh=jnp.asarray(uh_stacked),
        w1a=jnp.asarray(w1a), w1b=jnp.asarray(w1b_fused), w2b=jnp.asarray(w2b),
        b1f=jnp.asarray(np.tile(b1, W2)[None, :]),   # (1, W2*Cmid)
        b2f=jnp.asarray(np.tile(b2, W2)[None, :]),   # (1, W2*Cout)
        Cmid=Cmid, Cout=Cout, nb=nb)


# ----------------------------------------------------------------------------
# fused kernel: upsample + pads + concat-fold + conv1+ReLU + conv2+ReLU
# ----------------------------------------------------------------------------
def _make_up2c_kernel(NB, H1, W1, H2, W2, C1, C2, Cmid, Cout):
    M = NB * (H2 + 2) - 2   # stacked banded-dot rows (incl. discarded boundary rows)

    def kernel(x1_ref, x2_ref, uh_ref, w1a_ref, w1b_ref, w2b_ref,
               b1_ref, b2_ref, o_ref, x2s_ref, hs_ref):
        f32 = jnp.float32
        z2 = jnp.zeros((1, W2 * C2), f32)
        zm = jnp.zeros((1, W2 * Cmid), f32)

        # ---- stack x2 into the H-padded slab; only the 2 border rows per
        #      sample need zeroing (W-pad is folded into the band weights).
        #      Re-done every grid step so each TensorCore's scratch stays
        #      valid under "parallel" grid semantics.
        for n in range(NB):
            base = n * (H2 + 2)
            x2s_ref[base:base + 1, :] = z2
            x2s_ref[base + H2 + 1:base + H2 + 2, :] = z2
            x2s_ref[base + 1:base + 1 + H2, :] = x2_ref[0, n * H2:(n + 1) * H2, :]
            hs_ref[base:base + 1, :] = zm
            hs_ref[base + H2 + 1:base + H2 + 2, :] = zm

        # ---- H-upsample of x1 for the whole batch block (block-diag interp
        #      matrix carries the diff-pad + conv H-pad); the W-upsample is
        #      already folded into w1b_fused.
        t = jnp.dot(uh_ref[...], x1_ref[0],
                    preferred_element_type=f32)          # (NB*(H2+2), W1*C1)

        # ---- conv1 + bias + ReLU : 6 banded matmuls with stacked M ----------
        acc1 = jnp.zeros((M, W2 * Cmid), f32)
        for kh in range(3):
            acc1 = acc1 + jnp.dot(x2s_ref[kh:kh + M, :], w1a_ref[kh],
                                  preferred_element_type=f32)
            acc1 = acc1 + jnp.dot(t[kh:kh + M, :], w1b_ref[kh],
                                  preferred_element_type=f32)
        for n in range(NB):
            base = n * (H2 + 2)
            hs_ref[base + 1:base + 1 + H2, :] = jnp.maximum(
                acc1[base:base + H2, :] + b1_ref[...], 0.0)

        # ---- conv2 + bias + ReLU --------------------------------------------
        acc2 = jnp.zeros((M, W2 * Cout), f32)
        for kh in range(3):
            acc2 = acc2 + jnp.dot(hs_ref[kh:kh + M, :], w2b_ref[kh],
                                  preferred_element_type=f32)
        ys = [jnp.maximum(acc2[n * (H2 + 2):n * (H2 + 2) + H2, :] + b2_ref[...], 0.0)
              for n in range(NB)]

        # lane-dense store: batch block concatenated along lanes.
        o_ref[0] = jnp.concatenate(ys, axis=-1).astype(o_ref.dtype)

    return kernel


def up2c_forward(x1_nchw, x2_nchw, prep):
    N, C1, H1, W1 = x1_nchw.shape
    _, C2, H2, W2 = x2_nchw.shape
    Cmid, Cout, NB = prep["Cmid"], prep["Cout"], prep["nb"]
    NBLK = N // NB

    # NCHW -> flat lane-dense slabs, batch stacked along the row (M) axis.
    x1f = jnp.transpose(x1_nchw, (0, 2, 3, 1)).reshape(NBLK, NB * H1, W1 * C1)
    x2f = jnp.transpose(x2_nchw, (0, 2, 3, 1)).reshape(NBLK, NB * H2, W2 * C2)

    M = NB * (H2 + 2) - 2
    flops = NBLK * 2 * (NB * (H2 + 2) * (NB * H1) * (W1 * C1)
                        + 3 * M * (W2 * C2) * (W2 * Cmid)
                        + 3 * M * (W1 * C1) * (W2 * Cmid)
                        + 3 * M * (W2 * Cmid) * (W2 * Cout))
    const_bytes = 4 * int(prep["uh"].size + prep["w1a"].size + prep["w1b"].size
                          + prep["w2b"].size + prep["b1f"].size + prep["b2f"].size)
    io_bytes = 4 * int(x1f.size + x2f.size + NBLK * H2 * NB * W2 * Cout)
    bytes_accessed = const_bytes + io_bytes

    # v7x-aware VMEM budget: double-buffered IO blocks + constants + scratch
    # plus headroom, capped well below the 64 MiB physical limit.
    block_bytes = 4 * (NB * H1 * W1 * C1 + NB * H2 * W2 * C2 + H2 * NB * W2 * Cout)
    scratch_bytes = 4 * NB * (H2 + 2) * (W2 * C2 + W2 * Cmid)
    vmem_limit = int(min(64 << 20,
                         max(16 << 20,
                             2 * (const_bytes + block_bytes) + scratch_bytes
                             + (4 << 20))))

    kernel = _make_up2c_kernel(NB, H1, W1, H2, W2, C1, C2, Cmid, Cout)
    yf = pl.pallas_call(
        kernel,
        out_shape=jax.ShapeDtypeStruct((NBLK, H2, NB * W2 * Cout), x1_nchw.dtype),
        grid=(NBLK,),
        in_specs=[
            pl.BlockSpec((1, NB * H1, W1 * C1), lambda b: (b, 0, 0)),
            pl.BlockSpec((1, NB * H2, W2 * C2), lambda b: (b, 0, 0)),
            # grid-invariant constants (same block index every step).
            pl.BlockSpec((NB * (H2 + 2), NB * H1), lambda b: (0, 0)),
            pl.BlockSpec((3, W2 * C2, W2 * Cmid), lambda b: (0, 0, 0)),
            pl.BlockSpec((3, W1 * C1, W2 * Cmid), lambda b: (0, 0, 0)),
            pl.BlockSpec((3, W2 * Cmid, W2 * Cout), lambda b: (0, 0, 0)),
            pl.BlockSpec((1, W2 * Cmid), lambda b: (0, 0)),
            pl.BlockSpec((1, W2 * Cout), lambda b: (0, 0)),
        ],
        out_specs=pl.BlockSpec((1, H2, NB * W2 * Cout), lambda b: (b, 0, 0)),
        scratch_shapes=[
            pltpu.VMEM((NB * (H2 + 2), W2 * C2), jnp.float32),
            pltpu.VMEM((NB * (H2 + 2), W2 * Cmid), jnp.float32),
        ],
        compiler_params=pltpu.CompilerParams(
            dimension_semantics=("parallel",),
            vmem_limit_bytes=vmem_limit),
        cost_estimate=pl.CostEstimate(flops=flops, transcendentals=0,
                                      bytes_accessed=bytes_accessed),
    )(x1f, x2f, prep["uh"], prep["w1a"], prep["w1b"], prep["w2b"],
      prep["b1f"], prep["b2f"])

    # (NBLK, H2, NB*W2*Cout) lane-dense slab -> NCHW
    y = yf.reshape(NBLK, H2, NB, W2, Cout)
    return jnp.transpose(y, (0, 2, 4, 1, 3)).reshape(N, Cout, H2, W2)


# ----------------------------------------------------------------------------
# Pure-JAX reference (independent path: XLA conv + einsum upsample + pad/cat)
# ----------------------------------------------------------------------------
def up2c_reference(x1_nchw, x2_nchw, params):
    x1 = jnp.transpose(x1_nchw, (0, 2, 3, 1))
    x2 = jnp.transpose(x2_nchw, (0, 2, 3, 1))
    H1, W1 = x1.shape[1], x1.shape[2]
    uh = jnp.asarray(_bilinear_matrix(H1, 2 * H1))
    uw = jnp.asarray(_bilinear_matrix(W1, 2 * W1))
    t = jnp.einsum("oh,nhwc->nowc", uh, x1, precision=lax.Precision.HIGHEST)
    x1u = jnp.einsum("pw,nowc->nopc", uw, t, precision=lax.Precision.HIGHEST)
    diffY = x2.shape[1] - x1u.shape[1]
    diffX = x2.shape[2] - x1u.shape[2]
    x1u = jnp.pad(x1u, ((0, 0),
                        (diffY // 2, diffY - diffY // 2),
                        (diffX // 2, diffX - diffX // 2),
                        (0, 0)))
    x = jnp.concatenate([x2, x1u], axis=-1)

    def conv_relu(inp, w, b):
        out = lax.conv_general_dilated(
            inp, w, window_strides=(1, 1), padding="SAME",
            dimension_numbers=("NHWC", "HWIO", "NHWC"),
            precision=lax.Precision.HIGHEST)
        return jnp.maximum(out + b[None, None, None, :], 0.0)

    h = conv_relu(x, params["w1"], params["b1"])
    y = conv_relu(h, params["w2"], params["b2"])
    return jnp.transpose(y, (0, 3, 1, 2))


# ----------------------------------------------------------------------------
if __name__ == "__main__":
    # Up2C(in_channels=8, out_channels=4, bilinear=True)
    #   -> DoubleConv(8, 4, mid_channels=4), batch_norm=False, dropout=None
    in_channels = 8                    # = C(x2) + C(x1)
    mid_channels = in_channels // 2    # 4
    out_channels = 4

    key = jax.random.PRNGKey(0)
    k1, k2, k3, k4, k5, k6 = jax.random.split(key, 6)

    params = {
        "w1": jax.random.normal(k1, (3, 3, in_channels, mid_channels),
                                jnp.float32) * 0.1,
        "b1": jax.random.normal(k2, (mid_channels,), jnp.float32) * 0.01,
        "w2": jax.random.normal(k3, (3, 3, mid_channels, out_channels),
                                jnp.float32) * 0.1,
        "b2": jax.random.normal(k4, (out_channels,), jnp.float32) * 0.01,
    }

    # NCHW (PyTorch convention): x1 low-res, x2 skip connection at 2x res.
    x1 = jax.random.normal(k5, (2, 4, 8, 8), jnp.float32)
    x2 = jax.random.normal(k6, (2, 4, 16, 16), jnp.float32)

    prep = prepare_up2c(params, x1.shape, x2.shape)   # setup-time constants

    out = jax.block_until_ready(up2c_forward(x1, x2, prep))
    ref = jax.block_until_ready(up2c_reference(x1, x2, params))

    assert out.shape == (2, out_channels, 16, 16), out.shape
    np.testing.assert_allclose(np.asarray(out), np.asarray(ref),
                               rtol=1e-3, atol=1e-3)

    print("KERNEL_OK")
</pallas_src>

<mosaic_0001>
module attributes {stable_mosaic.version = 11 : i64} {
  func.func @kernel(%arg0: i32, %arg1: memref<1x16x32xf32, #tpu.memory_space<vmem>>, %arg2: memref<1x32x64xf32, #tpu.memory_space<vmem>>, %arg3: memref<36x16xf32, #tpu.memory_space<vmem>>, %arg4: memref<3x64x64xf32, #tpu.memory_space<vmem>>, %arg5: memref<3x32x64xf32, #tpu.memory_space<vmem>>, %arg6: memref<3x64x64xf32, #tpu.memory_space<vmem>>, %arg7: memref<1x64xf32, #tpu.memory_space<vmem>>, %arg8: memref<1x64xf32, #tpu.memory_space<vmem>>, %arg9: memref<1x16x128xf32, #tpu.memory_space<vmem>>, %arg10: memref<36x64xf32, #tpu.memory_space<vmem>>, %arg11: memref<36x64xf32, #tpu.memory_space<vmem>>) attributes {dimension_semantics = [#tpu.dimension_semantics<parallel>], iteration_bounds = array<i64: 1>, scalar_prefetch = 0 : i64, scratch_operands = 2 : i64, tpu.core_type = #tpu.core_type<tc>, window_params = [{transform_indices = @transform_0, window_bounds = array<i64: 1, 16, 32>}, {transform_indices = @transform_1, window_bounds = array<i64: 1, 32, 64>}, {pipeline_mode = #tpu.pipeline_mode<synchronous>, transform_indices = @transform_2, window_bounds = array<i64: 36, 16>}, {pipeline_mode = #tpu.pipeline_mode<synchronous>, transform_indices = @transform_3, window_bounds = array<i64: 3, 64, 64>}, {pipeline_mode = #tpu.pipeline_mode<synchronous>, transform_indices = @transform_4, window_bounds = array<i64: 3, 32, 64>}, {pipeline_mode = #tpu.pipeline_mode<synchronous>, transform_indices = @transform_5, window_bounds = array<i64: 3, 64, 64>}, {pipeline_mode = #tpu.pipeline_mode<synchronous>, transform_indices = @transform_6, window_bounds = array<i64: 1, 64>}, {pipeline_mode = #tpu.pipeline_mode<synchronous>, transform_indices = @transform_7, window_bounds = array<i64: 1, 64>}, {transform_indices = @transform_8, window_bounds = array<i64: 1, 16, 128>}]} {
    %cst = arith.constant 0.000000e+00 : f32
    %0 = vector.broadcast %cst : f32 to vector<1x64xf32>
    %cst_0 = arith.constant 0.000000e+00 : f32
    %1 = vector.broadcast %cst_0 : f32 to vector<1x64xf32>
    %c0 = arith.constant 0 : index
    %c0_1 = arith.constant 0 : index
    %2 = vector.load %arg10[%c0, %c0_1] : memref<36x64xf32, #tpu.memory_space<vmem>>, vector<1x64xf32>
    tpu.vector_store %arg10[%c0, %c0_1], %0 {strides = array<i32>} : memref<36x64xf32, #tpu.memory_space<vmem>>, vector<1x64xf32>,
    %c17 = arith.constant 17 : index
    %c0_2 = arith.constant 0 : index
    %3 = vector.load %arg10[%c17, %c0_2] : memref<36x64xf32, #tpu.memory_space<vmem>>, vector<1x64xf32>
    tpu.vector_store %arg10[%c17, %c0_2], %0 {strides = array<i32>} : memref<36x64xf32, #tpu.memory_space<vmem>>, vector<1x64xf32>,
    %c0_3 = arith.constant 0 : index
    %c0_4 = arith.constant 0 : index
    %c0_5 = arith.constant 0 : index
    %4 = vector.load %arg2[%c0_3, %c0_4, %c0_5] : memref<1x32x64xf32, #tpu.memory_space<vmem>>, vector<1x16x64xf32>
    %5 = vector.shape_cast %4 : vector<1x16x64xf32> to vector<16x64xf32>
    %c1 = arith.constant 1 : index
    %c0_6 = arith.constant 0 : index
    %6 = vector.load %arg10[%c1, %c0_6] : memref<36x64xf32, #tpu.memory_space<vmem>>, vector<16x64xf32>
    tpu.vector_store %arg10[%c1, %c0_6], %5 {strides = array<i32>} : memref<36x64xf32, #tpu.memory_space<vmem>>, vector<16x64xf32>,
    %c0_7 = arith.constant 0 : index
    %c0_8 = arith.constant 0 : index
    %7 = vector.load %arg11[%c0_7, %c0_8] : memref<36x64xf32, #tpu.memory_space<vmem>>, vector<1x64xf32>
    tpu.vector_store %arg11[%c0_7, %c0_8], %1 {strides = array<i32>} : memref<36x64xf32, #tpu.memory_space<vmem>>, vector<1x64xf32>,
    %c17_9 = arith.constant 17 : index
    %c0_10 = arith.constant 0 : index
    %8 = vector.load %arg11[%c17_9, %c0_10] : memref<36x64xf32, #tpu.memory_space<vmem>>, vector<1x64xf32>
    tpu.vector_store %arg11[%c17_9, %c0_10], %1 {strides = array<i32>} : memref<36x64xf32, #tpu.memory_space<vmem>>, vector<1x64xf32>,
    %c18 = arith.constant 18 : index
    %c0_11 = arith.constant 0 : index
    %9 = vector.load %arg10[%c18, %c0_11] : memref<36x64xf32, #tpu.memory_space<vmem>>, vector<1x64xf32>
    tpu.vector_store %arg10[%c18, %c0_11], %0 {strides = array<i32>} : memref<36x64xf32, #tpu.memory_space<vmem>>, vector<1x64xf32>,
    %c35 = arith.constant 35 : index
    %c0_12 = arith.constant 0 : index
    %10 = vector.load %arg10[%c35, %c0_12] : memref<36x64xf32, #tpu.memory_space<vmem>>, vector<1x64xf32>
    tpu.vector_store %arg10[%c35, %c0_12], %0 {strides = array<i32>} : memref<36x64xf32, #tpu.memory_space<vmem>>, vector<1x64xf32>,
    %c0_13 = arith.constant 0 : index
    %c16 = arith.constant 16 : index
    %c0_14 = arith.constant 0 : index
    %11 = vector.load %arg2[%c0_13, %c16, %c0_14] : memref<1x32x64xf32, #tpu.memory_space<vmem>>, vector<1x16x64xf32>
    %12 = vector.shape_cast %11 : vector<1x16x64xf32> to vector<16x64xf32>
    %c19 = arith.constant 19 : index
    %c0_15 = arith.constant 0 : index
    %13 = vector.load %arg10[%c19, %c0_15] : memref<36x64xf32, #tpu.memory_space<vmem>>, vector<16x64xf32>
    tpu.vector_store %arg10[%c19, %c0_15], %12 {strides = array<i32>} : memref<36x64xf32, #tpu.memory_space<vmem>>, vector<16x64xf32>,
    %c18_16 = arith.constant 18 : index
    %c0_17 = arith.constant 0 : index
    %14 = vector.load %arg11[%c18_16, %c0_17] : memref<36x64xf32, #tpu.memory_space<vmem>>, vector<1x64xf32>
    tpu.vector_store %arg11[%c18_16, %c0_17], %1 {strides = array<i32>} : memref<36x64xf32, #tpu.memory_space<vmem>>, vector<1x64xf32>,
    %c35_18 = arith.constant 35 : index
    %c0_19 = arith.constant 0 : index
    %15 = vector.load %arg11[%c35_18, %c0_19] : memref<36x64xf32, #tpu.memory_space<vmem>>, vector<1x64xf32>
    tpu.vector_store %arg11[%c35_18, %c0_19], %1 {strides = array<i32>} : memref<36x64xf32, #tpu.memory_space<vmem>>, vector<1x64xf32>,
    %c0_20 = arith.constant 0 : index
    %c0_21 = arith.constant 0 : index
    %16 = vector.load %arg3[%c0_20, %c0_21] : memref<36x16xf32, #tpu.memory_space<vmem>>, vector<36x16xf32>
    %c0_22 = arith.constant 0 : index
    %c0_23 = arith.constant 0 : index
    %c0_24 = arith.constant 0 : index
    %17 = vector.load %arg1[%c0_22, %c0_23, %c0_24] : memref<1x16x32xf32, #tpu.memory_space<vmem>>, vector<1x16x32xf32>
    %18 = vector.shape_cast %17 : vector<1x16x32xf32> to vector<16x32xf32>
    %cst_25 = arith.constant dense<0.000000e+00> : vector<36x32xf32>
    %19 = tpu.matmul %16, %18, %cst_25 {dimension_numbers = #tpu.dot_dimension_numbers<[1], [0], [0], [1], [0, 0, 1, 1], [], []>} : vector<36x16xf32>, vector<16x32xf32>, vector<36x32xf32> -> vector<36x32xf32>
    %cst_26 = arith.constant 0.000000e+00 : f32
    %20 = vector.broadcast %cst_26 : f32 to vector<34x64xf32>
    %c0_27 = arith.constant 0 : index
    %c0_28 = arith.constant 0 : index
    %21 = vector.load %arg10[%c0_27, %c0_28] : memref<36x64xf32, #tpu.memory_space<vmem>>, vector<34x64xf32>
    %c0_29 = arith.constant 0 : index
    %c0_30 = arith.constant 0 : index
    %c0_31 = arith.constant 0 : index
    %22 = vector.load %arg4[%c0_29, %c0_30, %c0_31] : memref<3x64x64xf32, #tpu.memory_space<vmem>>, vector<1x64x64xf32>
    %23 = vector.shape_cast %22 : vector<1x64x64xf32> to vector<64x64xf32>
    %cst_32 = arith.constant dense<0.000000e+00> : vector<34x64xf32>
    %24 = tpu.matmul %21, %23, %cst_32 {dimension_numbers = #tpu.dot_dimension_numbers<[1], [0], [0], [1], [0, 0, 1, 1], [], []>} : vector<34x64xf32>, vector<64x64xf32>, vector<34x64xf32> -> vector<34x64xf32>
    %25 = arith.addf %20, %24 : vector<34x64xf32>
    %26 = vector.extract_strided_slice %19 {offsets = [0, 0], sizes = [34, 32], strides = [1, 1]} : vector<36x32xf32> to vector<34x32xf32>
    %c0_33 = arith.constant 0 : index
    %c0_34 = arith.constant 0 : index
    %c0_35 = arith.constant 0 : index
    %27 = vector.load %arg5[%c0_33, %c0_34, %c0_35] : memref<3x32x64xf32, #tpu.memory_space<vmem>>, vector<1x32x64xf32>
    %28 = vector.shape_cast %27 : vector<1x32x64xf32> to vector<32x64xf32>
    %cst_36 = arith.constant dense<0.000000e+00> : vector<34x64xf32>
    %29 = tpu.matmul %26, %28, %cst_36 {dimension_numbers = #tpu.dot_dimension_numbers<[1], [0], [0], [1], [0, 0, 1, 1], [], []>} : vector<34x32xf32>, vector<32x64xf32>, vector<34x64xf32> -> vector<34x64xf32>
    %30 = arith.addf %25, %29 : vector<34x64xf32>
    %c1_37 = arith.constant 1 : index
    %c0_38 = arith.constant 0 : index
    %31 = vector.load %arg10[%c1_37, %c0_38] : memref<36x64xf32, #tpu.memory_space<vmem>>, vector<34x64xf32>
    %c1_39 = arith.constant 1 : index
    %c0_40 = arith.constant 0 : index
    %c0_41 = arith.constant 0 : index
    %32 = vector.load %arg4[%c1_39, %c0_40, %c0_41] : memref<3x64x64xf32, #tpu.memory_space<vmem>>, vector<1x64x64xf32>
    %33 = vector.shape_cast %32 : vector<1x64x64xf32> to vector<64x64xf32>
    %cst_42 = arith.constant dense<0.000000e+00> : vector<34x64xf32>
    %34 = tpu.matmul %31, %33, %cst_42 {dimension_numbers = #tpu.dot_dimension_numbers<[1], [0], [0], [1], [0, 0, 1, 1], [], []>} : vector<34x64xf32>, vector<64x64xf32>, vector<34x64xf32> -> vector<34x64xf32>
    %35 = arith.addf %30, %34 : vector<34x64xf32>
    %36 = vector.extract_strided_slice %19 {offsets = [1, 0], sizes = [34, 32], strides = [1, 1]} : vector<36x32xf32> to vector<34x32xf32>
    %c1_43 = arith.constant 1 : index
    %c0_44 = arith.constant 0 : index
    %c0_45 = arith.constant 0 : index
    %37 = vector.load %arg5[%c1_43, %c0_44, %c0_45] : memref<3x32x64xf32, #tpu.memory_space<vmem>>, vector<1x32x64xf32>
    %38 = vector.shape_cast %37 : vector<1x32x64xf32> to vector<32x64xf32>
    %cst_46 = arith.constant dense<0.000000e+00> : vector<34x64xf32>
    %39 = tpu.matmul %36, %38, %cst_46 {dimension_numbers = #tpu.dot_dimension_numbers<[1], [0], [0], [1], [0, 0, 1, 1], [], []>} : vector<34x32xf32>, vector<32x64xf32>, vector<34x64xf32> -> vector<34x64xf32>
    %40 = arith.addf %35, %39 : vector<34x64xf32>
    %c2 = arith.constant 2 : index
    %c0_47 = arith.constant 0 : index
    %41 = vector.load %arg10[%c2, %c0_47] : memref<36x64xf32, #tpu.memory_space<vmem>>, vector<34x64xf32>
    %c2_48 = arith.constant 2 : index
    %c0_49 = arith.constant 0 : index
    %c0_50 = arith.constant 0 : index
    %42 = vector.load %arg4[%c2_48, %c0_49, %c0_50] : memref<3x64x64xf32, #tpu.memory_space<vmem>>, vector<1x64x64xf32>
    %43 = vector.shape_cast %42 : vector<1x64x64xf32> to vector<64x64xf32>
    %cst_51 = arith.constant dense<0.000000e+00> : vector<34x64xf32>
    %44 = tpu.matmul %41, %43, %cst_51 {dimension_numbers = #tpu.dot_dimension_numbers<[1], [0], [0], [1], [0, 0, 1, 1], [], []>} : vector<34x64xf32>, vector<64x64xf32>, vector<34x64xf32> -> vector<34x64xf32>
    %45 = arith.addf %40, %44 : vector<34x64xf32>
    %46 = vector.extract_strided_slice %19 {offsets = [2, 0], sizes = [34, 32], strides = [1, 1]} : vector<36x32xf32> to vector<34x32xf32>
    %c2_52 = arith.constant 2 : index
    %c0_53 = arith.constant 0 : index
    %c0_54 = arith.constant 0 : index
    %47 = vector.load %arg5[%c2_52, %c0_53, %c0_54] : memref<3x32x64xf32, #tpu.memory_space<vmem>>, vector<1x32x64xf32>
    %48 = vector.shape_cast %47 : vector<1x32x64xf32> to vector<32x64xf32>
    %cst_55 = arith.constant dense<0.000000e+00> : vector<34x64xf32>
    %49 = tpu.matmul %46, %48, %cst_55 {dimension_numbers = #tpu.dot_dimension_numbers<[1], [0], [0], [1], [0, 0, 1, 1], [], []>} : vector<34x32xf32>, vector<32x64xf32>, vector<34x64xf32> -> vector<34x64xf32>
    %50 = arith.addf %45, %49 : vector<34x64xf32>
    %51 = vector.extract_strided_slice %50 {offsets = [0, 0], sizes = [16, 64], strides = [1, 1]} : vector<34x64xf32> to vector<16x64xf32>
    %c0_56 = arith.constant 0 : index
    %c0_57 = arith.constant 0 : index
    %52 = vector.load %arg7[%c0_56, %c0_57] : memref<1x64xf32, #tpu.memory_space<vmem>>, vector<1x64xf32>
    %53 = vector.broadcast %52 : vector<1x64xf32> to vector<16x64xf32>
    %54 = arith.addf %51, %53 : vector<16x64xf32>
    %cst_58 = arith.constant 0.000000e+00 : f32
    %55 = vector.broadcast %cst_58 : f32 to vector<16x64xf32>
    %56 = arith.maximumf %54, %55 : vector<16x64xf32>
    %c1_59 = arith.constant 1 : index
    %c0_60 = arith.constant 0 : index
    %57 = vector.load %arg11[%c1_59, %c0_60] : memref<36x64xf32, #tpu.memory_space<vmem>>, vector<16x64xf32>
    tpu.vector_store %arg11[%c1_59, %c0_60], %56 {strides = array<i32>} : memref<36x64xf32, #tpu.memory_space<vmem>>, vector<16x64xf32>,
    %58 = vector.extract_strided_slice %50 {offsets = [18, 0], sizes = [16, 64], strides = [1, 1]} : vector<34x64xf32> to vector<16x64xf32>
    %c0_61 = arith.constant 0 : index
    %c0_62 = arith.constant 0 : index
    %59 = vector.load %arg7[%c0_61, %c0_62] : memref<1x64xf32, #tpu.memory_space<vmem>>, vector<1x64xf32>
    %60 = vector.broadcast %59 : vector<1x64xf32> to vector<16x64xf32>
    %61 = arith.addf %58, %60 : vector<16x64xf32>
    %cst_63 = arith.constant 0.000000e+00 : f32
    %62 = vector.broadcast %cst_63 : f32 to vector<16x64xf32>
    %63 = arith.maximumf %61, %62 : vector<16x64xf32>
    %c19_64 = arith.constant 19 : index
    %c0_65 = arith.constant 0 : index
    %64 = vector.load %arg11[%c19_64, %c0_65] : memref<36x64xf32, #tpu.memory_space<vmem>>, vector<16x64xf32>
    tpu.vector_store %arg11[%c19_64, %c0_65], %63 {strides = array<i32>} : memref<36x64xf32, #tpu.memory_space<vmem>>, vector<16x64xf32>,
    %cst_66 = arith.constant 0.000000e+00 : f32
    %65 = vector.broadcast %cst_66 : f32 to vector<34x64xf32>
    %c0_67 = arith.constant 0 : index
    %c0_68 = arith.constant 0 : index
    %66 = vector.load %arg11[%c0_67, %c0_68] : memref<36x64xf32, #tpu.memory_space<vmem>>, vector<34x64xf32>
    %c0_69 = arith.constant 0 : index
    %c0_70 = arith.constant 0 : index
    %c0_71 = arith.constant 0 : index
    %67 = vector.load %arg6[%c0_69, %c0_70, %c0_71] : memref<3x64x64xf32, #tpu.memory_space<vmem>>, vector<1x64x64xf32>
    %68 = vector.shape_cast %67 : vector<1x64x64xf32> to vector<64x64xf32>
    %cst_72 = arith.constant dense<0.000000e+00> : vector<34x64xf32>
    %69 = tpu.matmul %66, %68, %cst_72 {dimension_numbers = #tpu.dot_dimension_numbers<[1], [0], [0], [1], [0, 0, 1, 1], [], []>} : vector<34x64xf32>, vector<64x64xf32>, vector<34x64xf32> -> vector<34x64xf32>
    %70 = arith.addf %65, %69 : vector<34x64xf32>
    %c1_73 = arith.constant 1 : index
    %c0_74 = arith.constant 0 : index
    %71 = vector.load %arg11[%c1_73, %c0_74] : memref<36x64xf32, #tpu.memory_space<vmem>>, vector<34x64xf32>
    %c1_75 = arith.constant 1 : index
    %c0_76 = arith.constant 0 : index
    %c0_77 = arith.constant 0 : index
    %72 = vector.load %arg6[%c1_75, %c0_76, %c0_77] : memref<3x64x64xf32, #tpu.memory_space<vmem>>, vector<1x64x64xf32>
    %73 = vector.shape_cast %72 : vector<1x64x64xf32> to vector<64x64xf32>
    %cst_78 = arith.constant dense<0.000000e+00> : vector<34x64xf32>
    %74 = tpu.matmul %71, %73, %cst_78 {dimension_numbers = #tpu.dot_dimension_numbers<[1], [0], [0], [1], [0, 0, 1, 1], [], []>} : vector<34x64xf32>, vector<64x64xf32>, vector<34x64xf32> -> vector<34x64xf32>
    %75 = arith.addf %70, %74 : vector<34x64xf32>
    %c2_79 = arith.constant 2 : index
    %c0_80 = arith.constant 0 : index
    %76 = vector.load %arg11[%c2_79, %c0_80] : memref<36x64xf32, #tpu.memory_space<vmem>>, vector<34x64xf32>
    %c2_81 = arith.constant 2 : index
    %c0_82 = arith.constant 0 : index
    %c0_83 = arith.constant 0 : index
    %77 = vector.load %arg6[%c2_81, %c0_82, %c0_83] : memref<3x64x64xf32, #tpu.memory_space<vmem>>, vector<1x64x64xf32>
    %78 = vector.shape_cast %77 : vector<1x64x64xf32> to vector<64x64xf32>
    %cst_84 = arith.constant dense<0.000000e+00> : vector<34x64xf32>
    %79 = tpu.matmul %76, %78, %cst_84 {dimension_numbers = #tpu.dot_dimension_numbers<[1], [0], [0], [1], [0, 0, 1, 1], [], []>} : vector<34x64xf32>, vector<64x64xf32>, vector<34x64xf32> -> vector<34x64xf32>
    %80 = arith.addf %75, %79 : vector<34x64xf32>
    %81 = vector.extract_strided_slice %80 {offsets = [0, 0], sizes = [16, 64], strides = [1, 1]} : vector<34x64xf32> to vector<16x64xf32>
    %c0_85 = arith.constant 0 : index
    %c0_86 = arith.constant 0 : index
    %82 = vector.load %arg8[%c0_85, %c0_86] : memref<1x64xf32, #tpu.memory_space<vmem>>, vector<1x64xf32>
    %83 = vector.broadcast %82 : vector<1x64xf32> to vector<16x64xf32>
    %84 = arith.addf %81, %83 : vector<16x64xf32>
    %cst_87 = arith.constant 0.000000e+00 : f32
    %85 = vector.broadcast %cst_87 : f32 to vector<16x64xf32>
    %86 = arith.maximumf %84, %85 : vector<16x64xf32>
    %87 = vector.extract_strided_slice %80 {offsets = [18, 0], sizes = [16, 64], strides = [1, 1]} : vector<34x64xf32> to vector<16x64xf32>
    %c0_88 = arith.constant 0 : index
    %c0_89 = arith.constant 0 : index
    %88 = vector.load %arg8[%c0_88, %c0_89] : memref<1x64xf32, #tpu.memory_space<vmem>>, vector<1x64xf32>
    %89 = vector.broadcast %88 : vector<1x64xf32> to vector<16x64xf32>
    %90 = arith.addf %87, %89 : vector<16x64xf32>
    %cst_90 = arith.constant 0.000000e+00 : f32
    %91 = vector.broadcast %cst_90 : f32 to vector<16x64xf32>
    %92 = arith.maximumf %90, %91 : vector<16x64xf32>
    %93 = tpu.concatenate %86, %92 in 1 : vector<16x64xf32>, vector<16x64xf32> -> vector<16x128xf32>
    %c0_91 = arith.constant 0 : index
    %c0_92 = arith.constant 0 : index
    %c0_93 = arith.constant 0 : index
    %94 = vector.load %arg9[%c0_91, %c0_92, %c0_93] : memref<1x16x128xf32, #tpu.memory_space<vmem>>, vector<1x16x128xf32>
    %95 = vector.shape_cast %94 : vector<1x16x128xf32> to vector<16x128xf32>
    %96 = vector.shape_cast %93 : vector<16x128xf32> to vector<1x16x128xf32>
    tpu.vector_store %arg9[%c0_91, %c0_92, %c0_93], %96 {strides = array<i32>} : memref<1x16x128xf32, #tpu.memory_space<vmem>>, vector<1x16x128xf32>,
    return
  }
  func.func @transform_0(%arg0: i32) -> (i32, i32, i32) {
    %c0_i32 = arith.constant 0 : i32
    %c0_i32_0 = arith.constant 0 : i32
    %c0_i32_1 = arith.constant 0 : i32
    return %arg0, %c0_i32, %c0_i32_0 : i32, i32, i32
  }
  func.func @transform_1(%arg0: i32) -> (i32, i32, i32) {
    %c0_i32 = arith.constant 0 : i32
    %c0_i32_0 = arith.constant 0 : i32
    %c0_i32_1 = arith.constant 0 : i32
    return %arg0, %c0_i32, %c0_i32_0 : i32, i32, i32
  }
  func.func @transform_2(%arg0: i32) -> (i32, i32) {
    %c0_i32 = arith.constant 0 : i32
    %c0_i32_0 = arith.constant 0 : i32
    %c0_i32_1 = arith.constant 0 : i32
    return %c0_i32, %c0_i32_0 : i32, i32
  }
  func.func @transform_3(%arg0: i32) -> (i32, i32, i32) {
    %c0_i32 = arith.constant 0 : i32
    %c0_i32_0 = arith.constant 0 : i32
    %c0_i32_1 = arith.constant 0 : i32
    %c0_i32_2 = arith.constant 0 : i32
    return %c0_i32, %c0_i32_0, %c0_i32_1 : i32, i32, i32
  }
  func.func @transform_4(%arg0: i32) -> (i32, i32, i32) {
    %c0_i32 = arith.constant 0 : i32
    %c0_i32_0 = arith.constant 0 : i32
    %c0_i32_1 = arith.constant 0 : i32
    %c0_i32_2 = arith.constant 0 : i32
    return %c0_i32, %c0_i32_0, %c0_i32_1 : i32, i32, i32
  }
  func.func @transform_5(%arg0: i32) -> (i32, i32, i32) {
    %c0_i32 = arith.constant 0 : i32
    %c0_i32_0 = arith.constant 0 : i32
    %c0_i32_1 = arith.constant 0 : i32
    %c0_i32_2 = arith.constant 0 : i32
    return %c0_i32, %c0_i32_0, %c0_i32_1 : i32, i32, i32
  }
  func.func @transform_6(%arg0: i32) -> (i32, i32) {
    %c0_i32 = arith.constant 0 : i32
    %c0_i32_0 = arith.constant 0 : i32
    %c0_i32_1 = arith.constant 0 : i32
    return %c0_i32, %c0_i32_0 : i32, i32
  }
  func.func @transform_7(%arg0: i32) -> (i32, i32) {
    %c0_i32 = arith.constant 0 : i32
    %c0_i32_0 = arith.constant 0 : i32
    %c0_i32_1 = arith.constant 0 : i32
    return %c0_i32, %c0_i32_0 : i32, i32
  }
  func.func @transform_8(%arg0: i32) -> (i32, i32, i32) {
    %c0_i32 = arith.constant 0 : i32
    %c0_i32_0 = arith.constant 0 : i32
    %c0_i32_1 = arith.constant 0 : i32
    return %arg0, %c0_i32, %c0_i32_0 : i32, i32, i32
  }
}

</mosaic_0001>

<bundles_post_ra>
// kernel: tpu_custom_call.1
= control target key start
LH: loop header
LB: loop body
LE: loop exit
PB: predicated region body
PF: predicated region fallthrough
CT: control target
= control target key end

     0   :  { %13 = vsyncpa [#allocation5], 0  ;;  %s2293_s0 = inlined_call_operand.vmem [shape: f32[1,16,32], index: 0, kind: input, shape index: {}]   ;;  %s2294_s1 = inlined_call_operand.vmem [shape: f32[1,32,64], index: 1, kind: input, shape index: {}]   ;;  %s2295_s2 = inlined_call_operand.vmem [shape: f32[36,16], index: 2, kind: input, shape index: {}]   ;;  %s2296_s3 = inlined_call_operand.hbm [shape: f32[3,64,64], index: 3, kind: input, shape index: {}]   ;;  %s2297_s4 = inlined_call_operand.hbm [shape: f32[3,32,64], index: 4, kind: input, shape index: {}]   ;;  %s2298_s5 = inlined_call_operand.hbm [shape: f32[3,64,64], index: 5, kind: input, shape index: {}]   ;;  %s2299_s6 = inlined_call_operand.vmem [shape: f32[1,64], index: 6, kind: input, shape index: {}]   ;;  %s2300_s7 = inlined_call_operand.vmem [shape: f32[1,64], index: 7, kind: input, shape index: {}]   ;;  %s2301_s8 = inlined_call_operand.hbm [shape: f32[1,16,128], index: 8, kind: output, shape index: {}]  }
   0x1   :  { %14 = vsyncpa [#allocation8], 0 }
   0x2   :  { %15 = vsyncpa [#allocation6], 0  ;;  %s1897_s27 = smov [#allocation7]   ;;  %s1898_s29 = smov [#allocation4]  }
   0x3   :  { %s39_s28 = sshll.u32 %s1897_s27, 4  ;;  %s27_s30 = sshll.u32 %s1898_s29, 4  ;;  %s40_s28 = int_to_ptr.vmem [resolvable:$true] %s39_s28  ;;  %s28_s30 = int_to_ptr.vmem [resolvable:$true] %s27_s30 }
   0x4   :  { %s1819_s9 = scalar_lea.vmem %s40_s28, 1536  ;;  %p1824_p1 = scmp.lt.s32.totalorder %s40_s28, %s40_s28 }
   0x5   :  { %p1820_p0 = scmp.ne.s32.totalorder %s40_s28, %s1819_s9  ;;  %p1825_p2 = scmp.lt.s32.totalorder %s1819_s9, %s1819_s9 }
   0x7   :  { %p1826_p3 = por %p1825_p2, %p1824_p1 }
   0x9   :  { %p1827_p4 = pnand %p1826_p3, %p1820_p0 }
   0xb   :  { %1830 = shalt.err (!%p1827_p4)
}
   0xc   :  { %s1899_s10 = smov 128   ;;  %s1900_s11 = smov 8  }
   0xd   :  { %45 = dma.hbm_to_vmem [thread:$0]  %s2297_s4, 1536, %s40_s28, [#allocation8], %s1899_s10, %s1899_s10, %s1900_s11  }
   0xe   :  { %s1839_s14 = scalar_lea.vmem %s28_s30, 3072  ;;  %p1844_p6 = scmp.lt.s32.totalorder %s28_s30, %s28_s30 }
   0xf   :  { %p1840_p5 = scmp.ne.s32.totalorder %s28_s30, %s1839_s14  ;;  %p1845_p7 = scmp.lt.s32.totalorder %s1839_s14, %s1839_s14 }
  0x11   :  { %p1846_p8 = por %p1845_p7, %p1844_p6 }
  0x13   :  { %p1847_p9 = pnand %p1846_p8, %p1840_p5 }
  0x15   :  { %1850 = shalt.err (!%p1847_p9)
}
  0x16   :  { %33 = dma.hbm_to_vmem [thread:$0]  %s2296_s3, 3072, %s28_s30, [#allocation5], %s1899_s10, %s1899_s10, %s1900_s11  }
  0x17   :  { %s1901_s17 = smov [#allocation9]  }
  0x18   :  { %s51_s18 = sshll.u32 %s1901_s17, 4  ;;  %s52_s18 = int_to_ptr.vmem [resolvable:$true] %s51_s18 }
  0x19   :  { %s1859_s19 = scalar_lea.vmem %s52_s18, 3072  ;;  %p1864_p11 = scmp.lt.s32.totalorder %s52_s18, %s52_s18 }
  0x1a   :  { %p1860_p10 = scmp.ne.s32.totalorder %s52_s18, %s1859_s19  ;;  %p1865_p12 = scmp.lt.s32.totalorder %s1859_s19, %s1859_s19 }
  0x1c   :  { %p1866_p13 = por %p1865_p12, %p1864_p11 }
  0x1e   :  { %p1867_p0 = pnand %p1866_p13, %p1860_p10 }
  0x20   :  { %1870 = shalt.err (!%p1867_p0)
}
  0x21   :  { %57 = dma.hbm_to_vmem [thread:$0]  %s2298_s5, 3072, %s52_s18, [#allocation8], %s1899_s10, %s1899_s10, %s1900_s11  }
  0x22   :  { %1891 = dma.done.wait [#allocation5], 3072  }
  0x23   :  { %1892 = vsyncadd [#allocation5], 4294964224 }
  0x24   :  { %1893 = dma.done.wait [#allocation8], 4608  }
  0x25   :  { %1894 = vsyncadd [#allocation8], 4294962688  ;;  %vm71_vm0 = vcmask 516096   ;;  %v1902_v0 = vmov 0.0   ;;  %vm1903_vm1 = vmmov 0   ;;  %v95_v1 = vld [vmem:[%s2293_s0 + $0x8] sm:$0xff] }
  0x26   :  { %1528 = vmatprep.subr.mxu0 %v1902_v0  ;;  %1532 = vmatprep.mubr.msk.f32.mxu0 %vm1903_vm1, %v1902_v0  ;;  %72 = vst.msk [vmem:[#allocation2] sm:$0x1] %vm71_vm0, %v1902_v0  ;;  %73 = vst.msk [vmem:[#allocation2 + $0x11] sm:$0x1] %vm71_vm0, %v1902_v0  ;;  %v94_v2 = vld [vmem:[%s2293_s0] sm:$0xff]  ;;  %vm96_vm2 = vcmask 130048  }
  0x27   :  { %79 = vst.msk [vmem:[#allocation3] sm:$0x1] %vm71_vm0, %v1902_v0  ;;  %80 = vst.msk [vmem:[#allocation3 + $0x11] sm:$0x1] %vm71_vm0, %v1902_v0  ;;  %1547 = vmatprep.subr.mxu1 %v1902_v0  ;;  %1555 = vmatprep.mubr.msk.f32.mxu1 %vm1903_vm1, %v1902_v0  ;;  %v89_v3 = vld [vmem:[%s2295_s2] sm:$0xff]  ;;  %v214_v4 = vld [vmem:[#allocation4 + $0x38] sm:$0xff] }
  0x28   :  { %81 = vst.msk [vmem:[#allocation2 + $0x12] sm:$0x1] %vm71_vm0, %v1902_v0  ;;  %82 = vst.msk [vmem:[#allocation2 + $0x23] sm:$0x1] %vm71_vm0, %v1902_v0  ;;  %1529 = vmatpush3.msra.mxu0 %v95_v1  ;;  %vm76_vm3 = vcmask 523264   ;;  %v90_v5 = vld [vmem:[%s2295_s2 + $0x8] sm:$0xff] }
  0x29   :  { %87 = vst.msk [vmem:[#allocation3 + $0x12] sm:$0x1] %vm71_vm0, %v1902_v0  ;;  %88 = vst.msk [vmem:[#allocation3 + $0x23] sm:$0x1] %vm71_vm0, %v1902_v0  ;;  %1530 = vmatprep.subr.mxu0 %v1902_v0  ;;  %v213_v6 = vld [vmem:[#allocation4 + $0x30] sm:$0xff]  ;;  %v75_v8 = vld [vmem:[%s2294_s1 + $0x8] sm:$0xff] }
  0x2a   :  { %1531 = vmatpush3.msra.mxu0 %v94_v2  ;;  %v74_v7 = vld [vmem:[%s2294_s1] sm:$0xff]  ;;  %v218_v9 = vld [vmem:[#allocation7 + $0x18] sm:$0xff]  ;;  %v212_v10 = vld [vmem:[#allocation4 + $0x28] sm:$0xff]  ;;  %78 = vst.msk [vmem:[#allocation2 + $0x9] sm:$0xff] %vm76_vm3, %v75_v8  ;;  %vm219_vm4 = vcmask 261120   ;;  %vm559_vm5 = vcmask 1046528  }
  0x2b   :  { %1533 = vmatmul.mubr.msk.f32.vlgmr.msra.gmra.mxu0 %vm96_vm2, %v89_v3  ;;  %1570 = vmatprep.subr.mxu0 %v1902_v0  ;;  %77 = vst.msk [vmem:[#allocation2 + $0x1] sm:$0xff] %vm76_vm3, %v74_v7  ;;  %v83_v11 = vld [vmem:[%s2294_s1 + $0x10] sm:$0xff]  ;;  %v217_v12 = vld [vmem:[#allocation7 + $0x10] sm:$0xff]  ;;  %v210_v15 = vld [vmem:[#allocation4 + $0x18] sm:$0xff]  ;;  %vm803_vm6 = vcmask 1045504   ;;  %vm944_vm7 = vcmask 523266  }
  0x2c   :  { %1535 = vmatprep.mubr.msk.f32.mxu0 %vm1903_vm1, %v1902_v0  ;;  %1571 = vmatpush3.msra.mxu0 %v214_v4  ;;  %85 = vst.msk [vmem:[#allocation2 + $0x13] sm:$0xff] %vm76_vm3, %v83_v11  ;;  %v211_v13 = vld [vmem:[#allocation4 + $0x20] sm:$0xff]  ;;  %v216_v16 = vld [vmem:[#allocation7 + $0x8] sm:$0xff]  ;;  %v209_v17 = vld [vmem:[#allocation4 + $0x10] sm:$0xff]  ;;  %vm947_vm8 = vcmask 517120   ;;  %s1905_s20 = smov [#allocation10]  }
  0x2d   :  { %1572 = vmatprep.subr.mxu0 %v1902_v0  ;;  %1548 = vmatpush3.msra.mxu1 %v218_v9  ;;  %v91_v14 = vld [vmem:[%s2295_s2 + $0x10] sm:$0xff]  ;;  %v92_v18 = vld [vmem:[%s2295_s2 + $0x18] sm:$0xff]  ;;  %v93_v22 = vld [vmem:[%s2295_s2 + $0x20] sm:$0xf]  ;;  %s1350_s3 = sshll.u32 %s1905_s20, 4  ;;  %s1351_s3 = int_to_ptr.vmem [resolvable:$true] %s1350_s3 }
  0x2e   :  { %1573 = vmatpush3.msra.mxu0 %v213_v6  ;;  %1549 = vmatprep.subr.mxu1 %v1902_v0  ;;  %v208_v19 = vld [vmem:[#allocation4 + $0x8] sm:$0xff]  ;;  %v215_v20 = vld [vmem:[#allocation7] sm:$0xff]  ;;  %v558_v28 = vld [vmem:[#allocation7 + $0x38] sm:$0xff]  ;;  %s1871_s5 = scalar_lea.vmem %s1351_s3, 256  ;;  %p1876_p2 = scmp.lt.s32.totalorder %s1351_s3, %s1351_s3 }
  0x2f   :  { %1536 = vmatmul.mubr.msk.f32.gmra.mxu0 %vm96_vm2, %v90_v5  ;;  %1574 = vmatprep.subr.mxu0 %v1902_v0  ;;  %v207_v21 = vld [vmem:[#allocation4] sm:$0xff]  ;;  %v84_v26 = vld [vmem:[%s2294_s1 + $0x18] sm:$0xff]  ;;  %v557_v29 = vld [vmem:[#allocation7 + $0x30] sm:$0xff]  ;;  %p1872_p1 = scmp.ne.s32.totalorder %s1351_s3, %s1871_s5  ;;  %p1877_p3 = scmp.lt.s32.totalorder %s1871_s5, %s1871_s5 }
  0x30   :  { %1538 = vmatprep.mubr.msk.f32.mxu0 %vm1903_vm1, %v1902_v0  ;;  %1575 = vmatpush3.msra.mxu0 %v212_v10  ;;  %86 = vst.msk [vmem:[#allocation2 + $0x1b] sm:$0xff] %vm76_vm3, %v84_v26  ;;  %v556_v31 = vld [vmem:[#allocation7 + $0x28] sm:$0xff]  ;;  %v555_v32 = vld [vmem:[#allocation7 + $0x20] sm:$0xff]  ;;  %v443_v33 = vld [vmem:[#allocation4 + $0x78] sm:$0xff] }
  0x31   :  { %1576 = vmatprep.subr.mxu0 %v1902_v0  ;;  %1550 = vmatpush3.msra.mxu1 %v217_v12  ;;  %v442_v35 = vld [vmem:[#allocation4 + $0x70] sm:$0xff]  ;;  %v441_v37 = vld [vmem:[#allocation4 + $0x68] sm:$0xff]  ;;  %v440_v41 = vld [vmem:[#allocation4 + $0x60] sm:$0xff]  ;;  %p1878_p4 = por %p1877_p3, %p1876_p2 }
  0x32   :  { %1577 = vmatpush3.msra.mxu0 %v211_v13  ;;  %1551 = vmatprep.subr.mxu1 %v1902_v0  ;;  %v202_v23 = vld [vmem:[#allocation2] sm:$0xff]  ;;  %v203_v24 = vld [vmem:[#allocation2 + $0x8] sm:$0xff]  ;;  %v437_v51 = vld [vmem:[#allocation4 + $0x48] sm:$0xff] }
  0x33   :  { %1539 = vmatmul.mubr.msk.f32.gmra.mxu0 %vm96_vm2, %v91_v14  ;;  %1578 = vmatprep.subr.mxu0 %v1902_v0  ;;  %v204_v25 = vld [vmem:[#allocation2 + $0x10] sm:$0xff]  ;;  %v439_v44 = vld [vmem:[#allocation4 + $0x58] sm:$0xff]  ;;  %v438_v47 = vld [vmem:[#allocation4 + $0x50] sm:$0xff]  ;;  %p1879_p5 = pnand %p1878_p4, %p1872_p1 }
  0x34   :  { %1541 = vmatprep.mubr.msk.f32.mxu0 %vm1903_vm1, %v1902_v0  ;;  %1579 = vmatpush3.msra.mxu0 %v210_v15  ;;  %v802_v52 = vld [vmem:[#allocation7 + $0x58] sm:$0xff]  ;;  %v436_v56 = vld [vmem:[#allocation4 + $0x40] sm:$0xff]  ;;  %v801_v63 = vld [vmem:[#allocation7 + $0x50] sm:$0xff] }
  0x35   :  { %1580 = vmatprep.subr.mxu0 %v1902_v0  ;;  %1552 = vmatpush3.msra.mxu1 %v216_v16  ;;  %v430_v60 = vld [vmem:[#allocation2 + $0x1] sm:$0xff]  ;;  %v431_v3 = vld [vmem:[#allocation2 + $0x9] sm:$0xff]  ;;  %v800_v5 = vld [vmem:[#allocation7 + $0x48] sm:$0xff] }
  0x36   :  { %1581 = vmatpush3.msra.mxu0 %v209_v17  ;;  %1553 = vmatprep.subr.mxu1 %v1902_v0  ;;  %v687_v62 = vld [vmem:[#allocation4 + $0xb8] sm:$0xff]  ;;  %v686_v2 = vld [vmem:[#allocation4 + $0xb0] sm:$0xff]  ;;  %v685_v6 = vld [vmem:[#allocation4 + $0xa8] sm:$0xff] }
  0x37   :  { %1542 = vmatmul.mubr.msk.f32.gmra.mxu0 %vm96_vm2, %v92_v18  ;;  %1582 = vmatprep.subr.mxu0 %v1902_v0  ;;  %v205_v27 = vld [vmem:[#allocation2 + $0x18] sm:$0xff]  ;;  %v206_v30 = vld [vmem:[#allocation2 + $0x20] sm:$0x3]  ;;  %v799_v9 = vld [vmem:[#allocation7 + $0x40] sm:$0xff] }
  0x38   :  { %1544 = vmatprep.mubr.msk.f32.mxu0 %vm1903_vm1, %v1902_v0  ;;  %1583 = vmatpush3.msra.mxu0 %v208_v19  ;;  %v432_v12 = vld [vmem:[#allocation2 + $0x11] sm:$0xff]  ;;  %v683_v17 = vld [vmem:[#allocation4 + $0x98] sm:$0xff]  ;;  %v433_v19 = vld [vmem:[#allocation2 + $0x19] sm:$0xff] }
  0x39   :  { %1584 = vmatprep.subr.mxu0 %v1902_v0  ;;  %1554 = vmatpush3.msra.mxu1 %v215_v20  ;;  %v684_v13 = vld [vmem:[#allocation4 + $0xa0] sm:$0xff] }
  0x3a   :  { %1585 = vmatpush3.msra.mxu0 %v207_v21  ;;  %1601 = vmatprep.subr.mxu1 %v1902_v0 }
  0x3b   :  { %1545 = vmatmul.mubr.msk.f32.gmra.mxu0 %vm96_vm2, %v93_v22  ;;  %1632 = vmatprep.subr.mxu0 %v1902_v0  ;;  %v682_v22 = vld [vmem:[#allocation4 + $0x90] sm:$0xff] }
  0x3c   :  { %1586 = vmatprep.mubr.msk.f32.mxu0 %vm1903_vm1, %v1902_v0 }
  0x3f   :  { %1587 = vmatmul.mubr.msk.f32.vlgmr.msra.gmra.mxu0 %vm76_vm3, %v202_v23  ;;  %v681_v23 = vld [vmem:[#allocation4 + $0x88] sm:$0xff] }
  0x40   :  { %1589 = vmatprep.mubr.msk.f32.mxu0 %vm1903_vm1, %v1902_v0  ;;  %1633 = vmatpush3.msra.mxu0 %v558_v28  ;;  %v674_v28 = vld [vmem:[#allocation2 + $0x2] sm:$0xff] }
  0x41   :  { %1634 = vmatprep.subr.mxu0 %v1902_v0 }
  0x42   :  { %1635 = vmatpush3.msra.mxu0 %v557_v29 }
  0x43   :  { %1590 = vmatmul.mubr.msk.f32.gmra.mxu0 %vm76_vm3, %v203_v24  ;;  %1636 = vmatprep.subr.mxu0 %v1902_v0  ;;  %v434_v24 = vld [vmem:[#allocation2 + $0x21] sm:$0x3] }
  0x44   :  { %1592 = vmatprep.mubr.msk.f32.mxu0 %vm1903_vm1, %v1902_v0  ;;  %1637 = vmatpush3.msra.mxu0 %v556_v31  ;;  %v676_v31 = vld [vmem:[#allocation2 + $0x12] sm:$0xff] }
  0x45   :  { %1638 = vmatprep.subr.mxu0 %v1902_v0 }
  0x46   :  { %1639 = vmatpush3.msra.mxu0 %v555_v32  ;;  %v677_v32 = vld [vmem:[#allocation2 + $0x1a] sm:$0xff] }
  0x47   :  { %1593 = vmatmul.mubr.msk.f32.gmra.mxu0 %vm76_vm3, %v204_v25  ;;  %1686 = vmatprep.subr.mxu0 %v1902_v0 }
  0x48   :  { %1595 = vmatprep.mubr.msk.f32.mxu0 %vm1903_vm1, %v1902_v0 }
  0x4b   :  { %1596 = vmatmul.mubr.msk.f32.gmra.mxu0 %vm76_vm3, %v205_v27  ;;  %v680_v27 = vld [vmem:[#allocation4 + $0x80] sm:$0xff] }
  0x4c   :  { %1598 = vmatprep.mubr.msk.f32.mxu0 %vm1903_vm1, %v1902_v0 }
  0x4f   :  { %1599 = vmatmul.mubr.msk.f32.gmra.mxu0 %vm76_vm3, %v206_v30  ;;  %v675_v30 = vld [vmem:[#allocation2 + $0xa] sm:$0xff] }
  0x50   :  { %1640 = vmatprep.mubr.msk.f32.mxu0 %vm1903_vm1, %v1902_v0 }
  0xeb   :  { %v2068_v34 = vpop.f32.mrf.mxu0 }
  0xec   :  { %1556 = vmatmul.mubr.msk.f32.vlgmr.msra.gmra.mxu1 %vm219_vm4, %v2068_v34  ;;  %v560_v39 = vrot.slane %v2068_v34, 1  ;;  %v804_v11 = vrot.slane %v2068_v34, 2 }
  0xed   :  { %1602 = vmatpush3.msra.mxu1 %v443_v33  ;;  %v1534_v36 = vpop.f32.mrf.mxu0  ;;  %1558 = vmatprep.mubr.msk.f32.mxu1 %vm1903_vm1, %v1902_v0  ;;  %v678_v33 = vld [vmem:[#allocation2 + $0x22] sm:$0x3] }
  0xee   :  { %1603 = vmatprep.subr.mxu1 %v1902_v0 }
  0xef   :  { %v2075_v38 = vpop.f32.mrf.mxu0  ;;  %1604 = vmatpush3.msra.mxu1 %v442_v35 }
  0xf0   :  { %v561_v40 = vrot.slane %v2075_v38, 1  ;;  %1559 = vmatmul.mubr.msk.f32.gmra.mxu1 %vm219_vm4, %v2075_v38  ;;  %1605 = vmatprep.subr.mxu1 %v1902_v0  ;;  %v805_v8 = vrot.slane %v2075_v38, 2  ;;  %v975_v38 = vld [vmem:[#allocation9 + $0x78] sm:$0xff] }
  0xf1   :  { %v1537_v42 = vpop.f32.mrf.mxu0  ;;  %1606 = vmatpush3.msra.mxu1 %v441_v37  ;;  %1561 = vmatprep.mubr.msk.f32.mxu1 %vm1903_vm1, %v1902_v0 }
  0xf2   :  { %v562_v43 = vsel %vm559_vm5, %v560_v39, %v561_v40  ;;  %1607 = vmatprep.subr.mxu1 %v1902_v0  ;;  %v806_v15 = vsel %vm803_vm6, %v804_v11, %v805_v8  ;;  %v961_v39 = vld [vmem:[#allocation9 + $0x38] sm:$0xff]  ;;  %v973_v42 = vld [vmem:[#allocation9 + $0x68] sm:$0xff] }
  0xf3   :  { %v2086_v45 = vpop.f32.mrf.mxu0  ;;  %1641 = vmatmul.mubr.msk.f32.vlgmr.msra.gmra.mxu0 %vm219_vm4, %v562_v43  ;;  %1608 = vmatpush3.msra.mxu1 %v440_v41  ;;  %v960_v41 = vld [vmem:[#allocation9 + $0x30] sm:$0xff]  ;;  %v959_v43 = vld [vmem:[#allocation9 + $0x28] sm:$0xff] }
  0xf4   :  { %v563_v46 = vrot.slane %v2086_v45, 1  ;;  %1562 = vmatmul.mubr.msk.f32.gmra.mxu1 %vm219_vm4, %v2086_v45  ;;  %1609 = vmatprep.subr.mxu1 %v1902_v0  ;;  %v807_v16 = vrot.slane %v2086_v45, 2  ;;  %v958_v45 = vld [vmem:[#allocation9 + $0x20] sm:$0xff] }
  0xf5   :  { %v1540_v48 = vpop.f32.mrf.mxu0  ;;  %1610 = vmatpush3.msra.mxu1 %v439_v44  ;;  %1643 = vmatprep.mubr.msk.f32.mxu0 %vm1903_vm1, %v1902_v0  ;;  %v972_v44 = vld [vmem:[#allocation9 + $0x60] sm:$0xff] }
  0xf6   :  { %1564 = vmatprep.mubr.msk.f32.mxu1 %vm1903_vm1, %v1902_v0  ;;  %v564_v49 = vsel %vm559_vm5, %v561_v40, %v563_v46  ;;  %1611 = vmatprep.subr.mxu1 %v1902_v0  ;;  %v808_v21 = vsel %vm803_vm6, %v805_v8, %v807_v16  ;;  %v974_v40 = vld [vmem:[#allocation9 + $0x70] sm:$0xff] }
  0xf7   :  { %v2099_v50 = vpop.f32.mrf.mxu0  ;;  %1644 = vmatmul.mubr.msk.f32.gmra.mxu0 %vm219_vm4, %v564_v49  ;;  %1612 = vmatpush3.msra.mxu1 %v438_v47  ;;  %v957_v47 = vld [vmem:[#allocation9 + $0x18] sm:$0xff]  ;;  %v970_v48 = vld [vmem:[#allocation9 + $0x50] sm:$0xff] }
  0xf8   :  { %v565_v53 = vrot.slane %v2099_v50, 1  ;;  %1565 = vmatmul.mubr.msk.f32.gmra.mxu1 %vm219_vm4, %v2099_v50  ;;  %1613 = vmatprep.subr.mxu1 %v1902_v0  ;;  %v809_v20 = vrot.slane %v2099_v50, 2  ;;  %v956_v49 = vld [vmem:[#allocation9 + $0x10] sm:$0xff]  ;;  %v969_v50 = vld [vmem:[#allocation9 + $0x48] sm:$0xff] }
  0xf9   :  { %v1543_v54 = vpop.f32.mrf.mxu0  ;;  %1646 = vmatprep.mubr.msk.f32.mxu0 %vm1903_vm1, %v1902_v0  ;;  %1567 = vmatprep.mubr.msk.f32.mxu1 %vm1903_vm1, %v1902_v0 }
  0xfa   :  { %1614 = vmatpush3.msra.mxu1 %v437_v51  ;;  %v566_v55 = vsel %vm559_vm5, %v563_v46, %v565_v53  ;;  %1687 = vmatpush3.msra.mxu0 %v802_v52  ;;  %v810_v26 = vsel %vm803_vm6, %v807_v16, %v809_v20  ;;  %v971_v46 = vld [vmem:[#allocation9 + $0x58] sm:$0xff]  ;;  %v955_v51 = vld [vmem:[#allocation9 + $0x8] sm:$0xff]  ;;  %v968_v52 = vld [vmem:[#allocation9 + $0x40] sm:$0xff] }
  0xfb   :  { %v2111_v57 = vpop.f32.mrf.mxu0  ;;  %1647 = vmatmul.mubr.msk.f32.gmra.mxu0 %vm219_vm4, %v566_v55  ;;  %1615 = vmatprep.subr.mxu1 %v1902_v0 }
  0xfc   :  { %v567_v58 = vrot.slane %v2111_v57, 1  ;;  %1568 = vmatmul.mubr.msk.f32.gmra.mxu1 %vm219_vm4, %v2111_v57  ;;  %1649 = vmatprep.mubr.msk.f32.mxu0 %vm1903_vm1, %v1902_v0  ;;  %v811_v25 = vrot.slane %v2111_v57, 2 }
  0xfd   :  { %v1546_v59 = vpop.f32.mrf.mxu0  ;;  %1616 = vmatpush3.msra.mxu1 %v436_v56  ;;  %1617 = vmatprep.mubr.msk.f32.mxu1 %vm1903_vm1, %v1902_v0 }
  0xfe   :  { %v568_v61 = vsel %vm559_vm5, %v565_v53, %v567_v58  ;;  %1655 = vmatprep.subr.mxu1 %v1902_v0  ;;  %1688 = vmatprep.subr.mxu0 %v1902_v0  ;;  %v812_v29 = vsel %vm803_vm6, %v809_v20, %v811_v25  ;;  %v954_v53 = vld [vmem:[#allocation9] sm:$0xff] }
  0xff   :  { %1650 = vmatmul.mubr.msk.f32.gmra.mxu0 %vm219_vm4, %v568_v61  ;;  %v2126_v1 = vpop.f32.mrf.mxu0 }
 0x100   :  { %1618 = vmatmul.mubr.msk.f32.vlgmr.msra.gmra.mxu1 %vm76_vm3, %v430_v60  ;;  %1652 = vmatprep.mubr.msk.f32.mxu0 %vm1903_vm1, %v1902_v0 }
 0x101   :  { %1656 = vmatpush3.msra.mxu1 %v687_v62  ;;  %1689 = vmatpush3.msra.mxu0 %v801_v63  ;;  %v1588_v4 = vpop.f32.mrf.mxu0 }
 0x102   :  { %1657 = vmatprep.subr.mxu1 %v1902_v0  ;;  %1620 = vmatprep.mubr.msk.f32.mxu1 %vm1903_vm1, %v1902_v0 }
 0x103   :  { %1653 = vmatmul.mubr.msk.f32.gmra.mxu0 %vm219_vm4, %v567_v58  ;;  %1658 = vmatpush3.msra.mxu1 %v686_v2  ;;  %v2135_v7 = vpop.f32.mrf.mxu0 }
 0x104   :  { %1690 = vmatprep.subr.mxu0 %v1902_v0  ;;  %1621 = vmatmul.mubr.msk.f32.gmra.mxu1 %vm76_vm3, %v431_v3 }
 0x105   :  { %1659 = vmatprep.subr.mxu1 %v1902_v0  ;;  %1691 = vmatpush3.msra.mxu0 %v800_v5  ;;  %v1591_v10 = vpop.f32.mrf.mxu0 }
 0x106   :  { %1660 = vmatpush3.msra.mxu1 %v685_v6  ;;  %1692 = vmatprep.subr.mxu0 %v1902_v0 }
 0x107   :  { %1693 = vmatpush3.msra.mxu0 %v799_v9  ;;  %1694 = vmatprep.mubr.msk.f32.mxu0 %vm1903_vm1, %v1902_v0  ;;  %v2145_v14 = vpop.f32.mrf.mxu0 }
 0x108   :  { %1623 = vmatprep.mubr.msk.f32.mxu1 %vm1903_vm1, %v1902_v0  ;;  %1661 = vmatprep.subr.mxu1 %v1902_v0 }
 0x109   :  { %1695 = vmatmul.mubr.msk.f32.vlgmr.msra.gmra.mxu0 %vm219_vm4, %v806_v15  ;;  %1624 = vmatmul.mubr.msk.f32.gmra.mxu1 %vm76_vm3, %v432_v12  ;;  %v1594_v18 = vpop.f32.mrf.mxu0 }
 0x10a   :  { %1662 = vmatpush3.msra.mxu1 %v684_v13  ;;  %1697 = vmatprep.mubr.msk.f32.mxu0 %vm1903_vm1, %v1902_v0 }
 0x10b   :  { %1663 = vmatprep.subr.mxu1 %v1902_v0  ;;  %1626 = vmatprep.mubr.msk.f32.mxu1 %vm1903_vm1, %v1902_v0  ;;  %v2202_v34 = vpop.f32.mrf.mxu0 }
 0x10c   :  { %1664 = vmatpush3.msra.mxu1 %v683_v17  ;;  %1740 = vmatprep.subr.mxu0 %v1902_v0 }
 0x10d   :  { %1698 = vmatmul.mubr.msk.f32.gmra.mxu0 %vm219_vm4, %v808_v21  ;;  %1627 = vmatmul.mubr.msk.f32.gmra.mxu1 %vm76_vm3, %v433_v19  ;;  %v1597_v35 = vpop.f32.mrf.mxu0 }
 0x10e   :  { %1665 = vmatprep.subr.mxu1 %v1902_v0  ;;  %1700 = vmatprep.mubr.msk.f32.mxu0 %vm1903_vm1, %v1902_v0 }
 0x10f   :  { %1666 = vmatpush3.msra.mxu1 %v682_v22  ;;  %1629 = vmatprep.mubr.msk.f32.mxu1 %vm1903_vm1, %v1902_v0  ;;  %v2204_v36 = vpop.f32.mrf.mxu0 }
 0x110   :  { %1667 = vmatprep.subr.mxu1 %v1902_v0  ;;  %1741 = vmatpush3.msra.mxu0 %v961_v39 }
 0x111   :  { %1668 = vmatpush3.msra.mxu1 %v681_v23  ;;  %1701 = vmatmul.mubr.msk.f32.gmra.mxu0 %vm219_vm4, %v810_v26  ;;  %v1600_v37 = vpop.f32.mrf.mxu0 }
 0x112   :  { %1630 = vmatmul.mubr.msk.f32.gmra.mxu1 %vm76_vm3, %v434_v24  ;;  %1669 = vmatprep.subr.mxu1 %v1902_v0 }
 0x113   :  { %1670 = vmatpush3.msra.mxu1 %v680_v27  ;;  %1703 = vmatprep.mubr.msk.f32.mxu0 %vm1903_vm1, %v1902_v0 }
 0x114   :  { %1671 = vmatprep.mubr.msk.f32.mxu1 %vm1903_vm1, %v1902_v0  ;;  %1709 = vmatprep.subr.mxu1 %v1902_v0 }
 0x115   :  { %1704 = vmatmul.mubr.msk.f32.gmra.mxu0 %vm219_vm4, %v812_v29  ;;  %1742 = vmatprep.subr.mxu0 %v1902_v0 }
 0x116   :  { %1672 = vmatmul.mubr.msk.f32.vlgmr.msra.gmra.mxu1 %vm76_vm3, %v674_v28  ;;  %1706 = vmatprep.mubr.msk.f32.mxu0 %vm1903_vm1, %v1902_v0 }
 0x117   :  { %1674 = vmatprep.mubr.msk.f32.mxu1 %vm1903_vm1, %v1902_v0  ;;  %1710 = vmatpush3.msra.mxu1 %v975_v38 }
 0x118   :  { %1711 = vmatprep.subr.mxu1 %v1902_v0  ;;  %1743 = vmatpush3.msra.mxu0 %v960_v41 }
 0x119   :  { %1707 = vmatmul.mubr.msk.f32.gmra.mxu0 %vm219_vm4, %v811_v25  ;;  %1712 = vmatpush3.msra.mxu1 %v974_v40 }
 0x11a   :  { %1675 = vmatmul.mubr.msk.f32.gmra.mxu1 %vm76_vm3, %v675_v30  ;;  %1756 = vmatprep.mubr.msk.f32.mxu0 %vm1903_vm1, %v1902_v0 }
 0x11b   :  { %1677 = vmatprep.mubr.msk.f32.mxu1 %vm1903_vm1, %v1902_v0  ;;  %1713 = vmatprep.subr.mxu1 %v1902_v0 }
 0x11c   :  { %1744 = vmatprep.subr.mxu0 %v1902_v0  ;;  %1714 = vmatpush3.msra.mxu1 %v973_v42 }
 0x11d   :  { %1745 = vmatpush3.msra.mxu0 %v959_v43  ;;  %1715 = vmatprep.subr.mxu1 %v1902_v0 }
 0x11e   :  { %1678 = vmatmul.mubr.msk.f32.gmra.mxu1 %vm76_vm3, %v676_v31  ;;  %1746 = vmatprep.subr.mxu0 %v1902_v0 }
 0x11f   :  { %1680 = vmatprep.mubr.msk.f32.mxu1 %vm1903_vm1, %v1902_v0  ;;  %1716 = vmatpush3.msra.mxu1 %v972_v44 }
 0x120   :  { %1747 = vmatpush3.msra.mxu0 %v958_v45  ;;  %1717 = vmatprep.subr.mxu1 %v1902_v0 }
 0x121   :  { %1748 = vmatprep.subr.mxu0 %v1902_v0  ;;  %1718 = vmatpush3.msra.mxu1 %v971_v46 }
 0x122   :  { %1681 = vmatmul.mubr.msk.f32.gmra.mxu1 %vm76_vm3, %v677_v32  ;;  %1749 = vmatpush3.msra.mxu0 %v957_v47 }
 0x123   :  { %1683 = vmatprep.mubr.msk.f32.mxu1 %vm1903_vm1, %v1902_v0  ;;  %1719 = vmatprep.subr.mxu1 %v1902_v0 }
 0x124   :  { %1750 = vmatprep.subr.mxu0 %v1902_v0  ;;  %1720 = vmatpush3.msra.mxu1 %v970_v48 }
 0x125   :  { %1751 = vmatpush3.msra.mxu0 %v956_v49  ;;  %1721 = vmatprep.subr.mxu1 %v1902_v0 }
 0x126   :  { %1684 = vmatmul.mubr.msk.f32.gmra.mxu1 %vm76_vm3, %v678_v33  ;;  %1752 = vmatprep.subr.mxu0 %v1902_v0 }
 0x127   :  { %1725 = vmatprep.mubr.msk.f32.mxu1 %vm1903_vm1, %v1902_v0  ;;  %1722 = vmatpush3.msra.mxu1 %v969_v50 }
 0x128   :  { %1753 = vmatpush3.msra.mxu0 %v955_v51  ;;  %1723 = vmatprep.subr.mxu1 %v1902_v0 }
 0x129   :  { %1754 = vmatprep.subr.mxu0 %v1902_v0  ;;  %1724 = vmatpush3.msra.mxu1 %v968_v52 }
 0x12a   :  { %1755 = vmatpush3.msra.mxu0 %v954_v53  ;;  %1771 = vmatprep.subr.mxu1 %v1902_v0 }
 0x1ac   :  { %v301_v54 = vpop.f32.mrf.mxu1 }
 0x1ad   :  { %v407_v24 = vadd.f32 %v2126_v1, %v301_v54  ;;  %v1398_v1 = vld [vmem:[%s2299_s6] ss:$0 sm:$0xff] }
 0x1ae   :  { %v1557_v55 = vpop.f32.mrf.mxu1 }
 0x1b0   :  { %v306_v56 = vpop.f32.mrf.mxu1 }
 0x1b1   :  { %v412_v30 = vadd.f32 %v2135_v7, %v306_v56 }
 0x1b2   :  { %v1560_v57 = vpop.f32.mrf.mxu1 }
 0x1b3   :  { %v645_v58 = vpop.f32.mrf.mxu0 }
 0x1b4   :  { %v311_v59 = vpop.f32.mrf.mxu1 }
 0x1b5   :  { %v1642_v60 = vpop.f32.mrf.mxu0  ;;  %v417_v39 = vadd.f32 %v2145_v14, %v311_v59 }
 0x1b6   :  { %v1563_v61 = vpop.f32.mrf.mxu1 }
 0x1b7   :  { %v650_v62 = vpop.f32.mrf.mxu0 }
 0x1b8   :  { %v316_v63 = vpop.f32.mrf.mxu1 }
 0x1b9   :  { %v1645_v2 = vpop.f32.mrf.mxu0  ;;  %v422_v47 = vadd.f32 %v2202_v34, %v316_v63 }
 0x1ba   :  { %v1566_v3 = vpop.f32.mrf.mxu1 }
 0x1bb   :  { %v655_v4 = vpop.f32.mrf.mxu0 }
 0x1bc   :  { %v321_v5 = vpop.f32.mrf.mxu1 }
 0x1bd   :  { %v1648_v6 = vpop.f32.mrf.mxu0  ;;  %v427_v56 = vadd.f32 %v2204_v36, %v321_v5  ;;  %v1199_v36 = vld [vmem:[#allocation9 + $0xb8] sm:$0xff] }
 0x1be   :  { %v1569_v8 = vpop.f32.mrf.mxu1 }
 0x1bf   :  { %v660_v9 = vpop.f32.mrf.mxu0 }
 0x1c0   :  { %v525_v10 = vpop.f32.mrf.mxu1 }
 0x1c1   :  { %v1651_v11 = vpop.f32.mrf.mxu0  ;;  %v549_v27 = vadd.f32 %v525_v10, %v407_v24  ;;  %v1196_v24 = vld [vmem:[#allocation9 + $0xa0] sm:$0xff] }
 0x1c2   :  { %v1619_v12 = vpop.f32.mrf.mxu1 }
 0x1c3   :  { %v665_v13 = vpop.f32.mrf.mxu0  ;;  %v669_v37 = vadd.f32 %v645_v58, %v549_v27  ;;  %v1195_v27 = vld [vmem:[#allocation9 + $0x98] sm:$0xff] }
 0x1c4   :  { %v530_v15 = vpop.f32.mrf.mxu1 }
 0x1c5   :  { %v1654_v16 = vpop.f32.mrf.mxu0  ;;  %v550_v33 = vadd.f32 %v530_v15, %v412_v30  ;;  %v1194_v30 = vld [vmem:[#allocation9 + $0x90] sm:$0xff] }
 0x1c6   :  { %v1622_v17 = vpop.f32.mrf.mxu1 }
 0x1c7   :  { %v670_v46 = vadd.f32 %v650_v62, %v550_v33 }
 0x1c9   :  { %v889_v18 = vpop.f32.mrf.mxu0  ;;  %v535_v19 = vpop.f32.mrf.mxu1 }
 0x1ca   :  { %v551_v43 = vadd.f32 %v535_v19, %v417_v39 }
 0x1cb   :  { %v1696_v20 = vpop.f32.mrf.mxu0  ;;  %v1625_v21 = vpop.f32.mrf.mxu1 }
 0x1cc   :  { %v671_v54 = vadd.f32 %v655_v4, %v551_v43  ;;  %v1197_v21 = vld [vmem:[#allocation9 + $0xa8] sm:$0xff] }
 0x1cd   :  { %v894_v22 = vpop.f32.mrf.mxu0  ;;  %v540_v23 = vpop.f32.mrf.mxu1 }
 0x1ce   :  { %v552_v52 = vadd.f32 %v540_v23, %v422_v47 }
 0x1cf   :  { %v1699_v25 = vpop.f32.mrf.mxu0  ;;  %v1628_v26 = vpop.f32.mrf.mxu1 }
 0x1d0   :  { %v672_v34 = vadd.f32 %v660_v9, %v552_v52  ;;  %v1198_v9 = vld [vmem:[#allocation9 + $0xb0] sm:$0xff] }
 0x1d1   :  { %v899_v28 = vpop.f32.mrf.mxu0 }
 0x1d2   :  { %v545_v29 = vpop.f32.mrf.mxu1 }
 0x1d3   :  { %v1702_v31 = vpop.f32.mrf.mxu0  ;;  %v553_v60 = vadd.f32 %v545_v29, %v427_v56 }
 0x1d4   :  { %v1631_v32 = vpop.f32.mrf.mxu1  ;;  %v1193_v31 = vld [vmem:[#allocation9 + $0x88] sm:$0xff] }
 0x1d5   :  { %v904_v35 = vpop.f32.mrf.mxu0  ;;  %v673_v10 = vadd.f32 %v665_v13, %v553_v60 }
 0x1d6   :  { %v769_v38 = vpop.f32.mrf.mxu1 }
 0x1d7   :  { %v793_v40 = vadd.f32 %v769_v38, %v669_v37  ;;  %v1705_v41 = vpop.f32.mrf.mxu0 }
 0x1d8   :  { %v1673_v42 = vpop.f32.mrf.mxu1 }
 0x1d9   :  { %v913_v44 = vadd.f32 %v889_v18, %v793_v40  ;;  %v909_v45 = vpop.f32.mrf.mxu0 }
 0x1da   :  { %v774_v7 = vpop.f32.mrf.mxu1 }
 0x1db   :  { %v925_v48 = vadd.f32 %v1398_v1, %v913_v44  ;;  %v794_v49 = vadd.f32 %v774_v7, %v670_v46  ;;  %v1708_v50 = vpop.f32.mrf.mxu0 }
 0x1dc   :  { %v1676_v51 = vpop.f32.mrf.mxu1 }
 0x1dd   :  { %v927_v14 = vmax.f32 %v925_v48, 0.0  ;;  %v914_v53 = vadd.f32 %v894_v22, %v794_v49 }
 0x1de   :  { %v779_v55 = vpop.f32.mrf.mxu1 }
 0x1df   :  { %929 = vst.msk [vmem:[#allocation3 + $0x1] sm:$0xff] %vm76_vm3, %v927_v14  ;;  %v926_v57 = vadd.f32 %v1398_v1, %v914_v53  ;;  %v795_v58 = vadd.f32 %v779_v55, %v671_v54 }
 0x1e0   :  { %v1679_v59 = vpop.f32.mrf.mxu1 }
 0x1e1   :  { %v928_v61 = vmax.f32 %v926_v57, 0.0  ;;  %v915_v62 = vadd.f32 %v899_v28, %v795_v58 }
 0x1e2   :  { %v784_v63 = vpop.f32.mrf.mxu1 }
 0x1e3   :  { %930 = vst.msk [vmem:[#allocation3 + $0x9] sm:$0xff] %vm76_vm3, %v928_v61  ;;  %v938_v2 = vadd.f32 %v1398_v1, %v915_v62  ;;  %v796_v3 = vadd.f32 %v784_v63, %v672_v34  ;;  %v1415_v61 = vld [vmem:[%s2300_s7] ss:$0 sm:$0xff]  ;;  %s1904_s7 = smov 64  }
 0x1e4   :  { %v1682_v6 = vpop.f32.mrf.mxu1 }
 0x1e5   :  { %v941_v4 = vmax.f32 %v938_v2, 0.0  ;;  %v916_v8 = vadd.f32 %v904_v35, %v796_v3  ;;  %v1192_v35 = vld [vmem:[#allocation9 + $0x80] sm:$0xff] }
 0x1e6   :  { %v789_v5 = vpop.f32.mrf.mxu1  ;;  %v962_v11 = vld [vmem:[#allocation3 + $0x1] sm:$0xff] }
 0x1e7   :  { %v949_v12 = vld [vmem:[#allocation3] sm:$0xff]  ;;  %945 = vst.msk [vmem:[#allocation3 + $0x11] sm:$0xfc] %vm944_vm7, %v941_v4  ;;  %v939_v15 = vadd.f32 %v1398_v1, %v916_v8  ;;  %v797_v16 = vadd.f32 %v789_v5, %v673_v10  ;;  %1726 = vmatmul.mubr.msk.f32.vlgmr.msra.gmra.mxu1 %vm76_vm3, %v962_v11 }
 0x1e8   :  { %1757 = vmatmul.mubr.msk.f32.vlgmr.msra.gmra.mxu0 %vm76_vm3, %v949_v12  ;;  %1772 = vmatpush3.msra.mxu1 %v1199_v36  ;;  %v1685_v17 = vpop.f32.mrf.mxu1 }
 0x1e9   :  { %1728 = vmatprep.mubr.msk.f32.mxu1 %vm1903_vm1, %v1902_v0  ;;  %v942_v18 = vmax.f32 %v939_v15, 0.0  ;;  %v917_v19 = vadd.f32 %v909_v45, %v797_v16  ;;  %1773 = vmatprep.subr.mxu1 %v1902_v0 }
 0x1ea   :  { %1759 = vmatprep.mubr.msk.f32.mxu0 %vm1903_vm1, %v1902_v0  ;;  %1774 = vmatpush3.msra.mxu1 %v1198_v9  ;;  %v963_v13 = vld [vmem:[#allocation3 + $0x9] sm:$0xff] }
 0x1eb   :  { %v950_v20 = vld [vmem:[#allocation3 + $0x8] sm:$0xff]  ;;  %946 = vst.msk [vmem:[#allocation3 + $0x19] sm:$0xff] %vm76_vm3, %v942_v18  ;;  %v940_v22 = vadd.f32 %v1398_v1, %v917_v19  ;;  %1729 = vmatmul.mubr.msk.f32.gmra.mxu1 %vm76_vm3, %v963_v13  ;;  %1775 = vmatprep.subr.mxu1 %v1902_v0 }
 0x1ec   :  { %1760 = vmatmul.mubr.msk.f32.gmra.mxu0 %vm76_vm3, %v950_v20  ;;  %1731 = vmatprep.mubr.msk.f32.mxu1 %vm1903_vm1, %v1902_v0  ;;  %v1186_v37 = vld [vmem:[#allocation3 + $0x2] sm:$0xff]  ;;  %v1187_v38 = vld [vmem:[#allocation3 + $0xa] sm:$0xff] }
 0x1ed   :  { %v943_v23 = vmax.f32 %v940_v22, 0.0  ;;  %1776 = vmatpush3.msra.mxu1 %v1197_v21  ;;  %1762 = vmatprep.mubr.msk.f32.mxu0 %vm1903_vm1, %v1902_v0 }
 0x1ee   :  { %1777 = vmatprep.subr.mxu1 %v1902_v0  ;;  %v964_v25 = vld [vmem:[#allocation3 + $0x11] sm:$0xff] }
 0x1ef   :  { %v951_v26 = vld [vmem:[#allocation3 + $0x10] sm:$0xff]  ;;  %948 = vst.msk [vmem:[#allocation3 + $0x21] sm:$0x3] %vm947_vm8, %v943_v23  ;;  %1732 = vmatmul.mubr.msk.f32.gmra.mxu1 %vm76_vm3, %v964_v25 }
 0x1f0   :  { %1763 = vmatmul.mubr.msk.f32.gmra.mxu0 %vm76_vm3, %v951_v26  ;;  %1778 = vmatpush3.msra.mxu1 %v1196_v24 }
 0x1f1   :  { %1734 = vmatprep.mubr.msk.f32.mxu1 %vm1903_vm1, %v1902_v0  ;;  %1779 = vmatprep.subr.mxu1 %v1902_v0 }
 0x1f2   :  { %1765 = vmatprep.mubr.msk.f32.mxu0 %vm1903_vm1, %v1902_v0  ;;  %1780 = vmatpush3.msra.mxu1 %v1195_v27  ;;  %v965_v28 = vld [vmem:[#allocation3 + $0x19] sm:$0xff] }
 0x1f3   :  { %v952_v29 = vld [vmem:[#allocation3 + $0x18] sm:$0xff]  ;;  %1735 = vmatmul.mubr.msk.f32.gmra.mxu1 %vm76_vm3, %v965_v28  ;;  %1781 = vmatprep.subr.mxu1 %v1902_v0 }
 0x1f4   :  { %1766 = vmatmul.mubr.msk.f32.gmra.mxu0 %vm76_vm3, %v952_v29  ;;  %1737 = vmatprep.mubr.msk.f32.mxu1 %vm1903_vm1, %v1902_v0  ;;  %v1188_v39 = vld [vmem:[#allocation3 + $0x12] sm:$0xff] }
 0x1f5   :  { %1782 = vmatpush3.msra.mxu1 %v1194_v30  ;;  %1768 = vmatprep.mubr.msk.f32.mxu0 %vm1903_vm1, %v1902_v0 }
 0x1f6   :  { %1783 = vmatprep.subr.mxu1 %v1902_v0  ;;  %v966_v32 = vld [vmem:[#allocation3 + $0x21] sm:$0x3] }
 0x1f7   :  { %v953_v33 = vld [vmem:[#allocation3 + $0x20] sm:$0x3]  ;;  %1784 = vmatpush3.msra.mxu1 %v1193_v31  ;;  %v1190_v41 = vld [vmem:[#allocation3 + $0x22] sm:$0x3] }
 0x1f8   :  { %1769 = vmatmul.mubr.msk.f32.gmra.mxu0 %vm76_vm3, %v953_v33  ;;  %1738 = vmatmul.mubr.msk.f32.gmra.mxu1 %vm76_vm3, %v966_v32  ;;  %v1189_v40 = vld [vmem:[#allocation3 + $0x1a] sm:$0xff] }
 0x1f9   :  { %1785 = vmatprep.subr.mxu1 %v1902_v0  ;;  %1787 = vmatprep.mubr.msk.f32.mxu1 %vm1903_vm1, %v1902_v0 }
 0x1fa   :  { %1786 = vmatpush3.msra.mxu1 %v1192_v35 }
 0x1fc   :  { %1788 = vmatmul.mubr.msk.f32.vlgmr.msra.gmra.mxu1 %vm76_vm3, %v1186_v37 }
 0x1fd   :  { %1790 = vmatprep.mubr.msk.f32.mxu1 %vm1903_vm1, %v1902_v0 }
 0x200   :  { %1791 = vmatmul.mubr.msk.f32.gmra.mxu1 %vm76_vm3, %v1187_v38 }
 0x201   :  { %1793 = vmatprep.mubr.msk.f32.mxu1 %vm1903_vm1, %v1902_v0 }
 0x204   :  { %1794 = vmatmul.mubr.msk.f32.gmra.mxu1 %vm76_vm3, %v1188_v39 }
 0x205   :  { %1796 = vmatprep.mubr.msk.f32.mxu1 %vm1903_vm1, %v1902_v0 }
 0x208   :  { %1797 = vmatmul.mubr.msk.f32.gmra.mxu1 %vm76_vm3, %v1189_v40 }
 0x209   :  { %1799 = vmatprep.mubr.msk.f32.mxu1 %vm1903_vm1, %v1902_v0 }
 0x20c   :  { %1800 = vmatmul.mubr.msk.f32.gmra.mxu1 %vm76_vm3, %v1190_v41 }
 0x2a7   :  { %v1057_v1 = vpop.f32.mrf.mxu1 }
 0x2a8   :  { %v1162_v42 = vpop.f32.mrf.mxu0 }
 0x2a9   :  { %v1163_v43 = vadd.f32 %v1162_v42, %v1057_v1  ;;  %v1727_v44 = vpop.f32.mrf.mxu1 }
 0x2aa   :  { %v1758_v45 = vpop.f32.mrf.mxu0 }
 0x2ab   :  { %v1062_v46 = vpop.f32.mrf.mxu1 }
 0x2ac   :  { %v1167_v7 = vpop.f32.mrf.mxu0 }
 0x2ad   :  { %v1168_v47 = vadd.f32 %v1167_v7, %v1062_v46  ;;  %v1730_v48 = vpop.f32.mrf.mxu1 }
 0x2ae   :  { %v1761_v49 = vpop.f32.mrf.mxu0 }
 0x2af   :  { %v1067_v50 = vpop.f32.mrf.mxu1 }
 0x2b0   :  { %v1172_v51 = vpop.f32.mrf.mxu0 }
 0x2b1   :  { %v1733_v52 = vpop.f32.mrf.mxu1  ;;  %v1173_v4 = vadd.f32 %v1172_v51, %v1067_v50 }
 0x2b2   :  { %v1764_v14 = vpop.f32.mrf.mxu0 }
 0x2b3   :  { %v1072_v53 = vpop.f32.mrf.mxu1 }
 0x2b4   :  { %v1177_v54 = vpop.f32.mrf.mxu0 }
 0x2b5   :  { %v1736_v0 = vpop.f32.mrf.mxu1  ;;  %v1178_v11 = vadd.f32 %v1177_v54, %v1072_v53 }
 0x2b6   :  { %v1767_v55 = vpop.f32.mrf.mxu0 }
 0x2b8   :  { %v1182_v56 = vpop.f32.mrf.mxu0  ;;  %v1077_v57 = vpop.f32.mrf.mxu1 }
 0x2b9   :  { %v1183_v17 = vadd.f32 %v1182_v56, %v1077_v57 }
 0x2ba   :  { %v1770_v58 = vpop.f32.mrf.mxu0  ;;  %v1739_v59 = vpop.f32.mrf.mxu1 }
 0x2bc   :  { %v1281_v60 = vpop.f32.mrf.mxu1 }
 0x2bd   :  { %v1305_v62 = vadd.f32 %v1281_v60, %v1163_v43 }
 0x2be   :  { %v1789_v34 = vpop.f32.mrf.mxu1 }
 0x2bf   :  { %v1317_v63 = vadd.f32 %v1415_v61, %v1305_v62 }
 0x2c0   :  { %v1286_v2 = vpop.f32.mrf.mxu1 }
 0x2c1   :  { %v1306_v3 = vadd.f32 %v1286_v2, %v1168_v47  ;;  %v1319_v30 = vmax.f32 %v1317_v63, 0.0 }
 0x2c2   :  { %v1792_v6 = vpop.f32.mrf.mxu1 }
 0x2c3   :  { %v1318_v8 = vadd.f32 %v1415_v61, %v1306_v3 }
 0x2c4   :  { %v1291_v10 = vpop.f32.mrf.mxu1 }
 0x2c5   :  { %v1307_v36 = vadd.f32 %v1291_v10, %v1173_v4  ;;  %v1320_v33 = vmax.f32 %v1318_v8, 0.0 }
 0x2c6   :  { %v1795_v5 = vpop.f32.mrf.mxu1 }
 0x2c7   :  { %v1321_v12 = vadd.f32 %v1415_v61, %v1307_v36 }
 0x2c8   :  { %v1296_v15 = vpop.f32.mrf.mxu1 }
 0x2c9   :  { %v1308_v16 = vadd.f32 %v1296_v15, %v1178_v11  ;;  %v1324_v18 = vmax.f32 %v1321_v12, 0.0 }
 0x2ca   :  { %v1798_v9 = vpop.f32.mrf.mxu1 }
 0x2cb   :  { %v1322_v19 = vadd.f32 %v1415_v61, %v1308_v16  ;;  %v1330_v23 = vrot.slane %v1324_v18, 2 }
 0x2cc   :  { %v1301_v13 = vpop.f32.mrf.mxu1 }
 0x2cd   :  { %v1325_v20 = vmax.f32 %v1322_v19, 0.0  ;;  %v1309_v21 = vadd.f32 %v1301_v13, %v1183_v17 }
 0x2ce   :  { %v1801_v22 = vpop.f32.mrf.mxu1 }
 0x2cf   :  { %v1331_v24 = vrot.slane %v1325_v20, 2  ;;  %v1323_v25 = vadd.f32 %v1415_v61, %v1309_v21 }
 0x2d1   :  { %v1326_v26 = vmax.f32 %v1323_v25, 0.0  ;;  %v1332_v27 = vsel %vm803_vm6, %v1330_v23, %v1331_v24 }
 0x2d2   :  { %1335 = vrot.lane.b32.xlu0 %v1332_v27, %s1904_s7 }
 0x2d3   :  { %v1333_v28 = vrot.slane %v1326_v26, 2 }
 0x2d5   :  { %v1334_v29 = vsel %vm803_vm6, %v1331_v24, %v1333_v28 }
 0x2d6   :  { %1337 = vrot.lane.b32.xlu0 %v1334_v29, %s1904_s7 }
 0x344   :  { %v1336_v31 = vpop.permute.xlu0 %1335 }
 0x345   :  { %v1341_v32 = vsel %vm76_vm3, %v1319_v30, %v1336_v31 }
 0x346   :  { %1343 = vst [vmem:[#allocation10] sm:$0xff] %v1341_v32 }
 0x348   :  { %v1338_v35 = vpop.permute.xlu0 %1337 }
 0x349   :  { %v1342_v37 = vsel %vm76_vm3, %v1320_v33, %v1338_v35 }
 0x34a   :  { %1344 = vst [vmem:[#allocation10 + $0x8] sm:$0xff] %v1342_v37 }
 0x34b   :  { %1882 = shalt.err (!%p1879_p5)
}
 0x34c   :  { %1356 = dma.vmem_to_hbm [thread:$0]  %s1351_s3, 256, %s2301_s8, [#allocation6], %s1899_s10, %s1899_s10, %s1900_s11  }
 0x34d   :  { %1895 = dma.done.wait [#allocation6], 256  }
 0x34e   :  { %1896 = vsyncadd [#allocation6], 4294967040 }
 0x34f   :  { %1360 = vsyncpa [#allocation5], 1 }
 0x350   :  { %1361 = vsyncpa [#allocation8], 1 }
 0x351   :  { %1362 = vsyncpa [#allocation6], 1 }

</bundles_post_ra>
